<compile_context>
chip_gen: v7x
topology: tpu7x:2x2x1
jax: 0.10.0
libtpu: 0.0.40
codegen_flags: <defaults>
</compile_context>

<pallas_src>
import functools

import jax
import jax.numpy as jnp
from jax.experimental import pallas as pl
from jax.experimental.pallas import tpu as pltpu


def _lstm_proj_kernel(x_ref, h0_ref, c0_ref, wih_ref, whh_ref, b_ref,
                      wp_ref, bp_ref,
                      y_ref, hn_ref, cn_ref,
                      hseq_ref):
    """Whole-sequence LSTM + hoisted output projection, single grid step.

    x_ref   : (T*B, E)   bf16, time-major, flattened (row t*B+b == step t, batch b)
    h0/c0   : (B, H)     f32 initial states
    wih     : (E, 4H)    bf16 input->gates weight (PyTorch weight_ih_l0 transposed)
    whh     : (H, 4H)    bf16 hidden->gates weight (PyTorch weight_hh_l0 transposed)
    b       : (1, 4H)    f32  b_ih + b_hh
    wp      : (H, Lp)    bf16 projection weight, lane-padded to Lp (multiple of 128)
    bp      : (1, Lp)    f32  projection bias, lane-padded
    y_ref   : (T*B, Lp)  f32 logits (lane-dense, single full-block store)
    hn/cn   : (B, H)     f32 final states (written once, after the loop)
    hseq_ref: (T*B, H)   f32 VMEM scratch holding every step's h
    """
    TB, _ = x_ref.shape
    B, H = h0_ref.shape
    T = TB // B

    # Hoist all loop-invariant loads out of the recurrence.
    whh = whh_ref[...]                                         # bf16 (H, 4H)

    # Input contribution to the gates for every time step in one bf16 MXU call,
    # completely off the serial h-recurrence critical path; bias folded in.
    xg = (jnp.dot(x_ref[...], wih_ref[...],
                  preferred_element_type=jnp.float32)
          + b_ref[...])                                        # f32 (T*B, 4H)

    h = h0_ref[...]                                            # f32 (B, H)
    c = c0_ref[...]                                            # f32 (B, H)

    # Static, fully-unrolled time loop (T is small & static).  Per-step work on
    # the critical path is ONE small bf16 matmul + f32 activations; the
    # projection is not in here anymore.
    for t in range(T):
        g_x = xg[t * B:(t + 1) * B, :]                         # static slice (B, 4H)
        gates = g_x + jnp.dot(h.astype(jnp.bfloat16), whh,
                              preferred_element_type=jnp.float32)

        # Whole-vreg activations (4H == 128 lanes) in f32, then cheap lane slices.
        sig = jax.nn.sigmoid(gates)
        th = jnp.tanh(gates)
        i_g = sig[:, 0 * H:1 * H]
        f_g = sig[:, 1 * H:2 * H]
        g_g = th[:, 2 * H:3 * H]
        o_g = sig[:, 3 * H:4 * H]

        c = f_g * c + i_g * g_g
        h = o_g * jnp.tanh(c)

        # Stash h for the post-loop projection (cheap VMEM scratch store,
        # off the output path).
        hseq_ref[t * B:(t + 1) * B, :] = h

    # Final states written exactly once.
    hn_ref[...] = h
    cn_ref[...] = c

    # Hoisted projection: one (T*B, H) @ (H, Lp) bf16 MXU call + bias, then a
    # single lane/sublane-dense store of the whole logits block.
    y_ref[...] = (jnp.dot(hseq_ref[...].astype(jnp.bfloat16), wp_ref[...],
                          preferred_element_type=jnp.float32)
                  + bp_ref[...])


def prepare_params(raw):
    """One-time (out of the per-call path) param prep: lane padding + bf16 casts."""
    H, L = raw["w_proj"].shape
    Lp = max(128, ((L + 127) // 128) * 128)                    # lane-dense output width
    wp = jnp.zeros((H, Lp), jnp.float32).at[:, :L].set(
        raw["w_proj"]).astype(jnp.bfloat16)
    bp = jnp.zeros((1, Lp), jnp.float32).at[:, :L].set(raw["b_proj"])
    return {
        "w_ih": raw["w_ih"].astype(jnp.bfloat16),              # (E, 4H)
        "w_hh": raw["w_hh"].astype(jnp.bfloat16),              # (H, 4H)
        "bias": raw["bias"].astype(jnp.float32),               # (1, 4H)
        "w_proj_p": wp,                                        # (H, Lp) bf16
        "b_proj_p": bp,                                        # (1, Lp) f32
    }


def incremental_base_forward(x_btE, states, p, *, label_size):
    """x_btE: (B, T, E) float (batch_first, like PyTorch). states: None or (h0, c0)
    with shape (1, B, H) each. p: prepare_params() output.
    Returns (logits (B,T,L), (h_n (1,B,H), c_n (1,B,H)))."""
    B, T, E = x_btE.shape
    H = p["w_hh"].shape[0]
    Lp = p["w_proj_p"].shape[1]
    L = label_size

    if states is None or states[0] is None or states[1] is None:
        h0 = jnp.zeros((B, H), jnp.float32)
        c0 = jnp.zeros((B, H), jnp.float32)
    else:
        h0 = states[0].reshape(B, H).astype(jnp.float32)
        c0 = states[1].reshape(B, H).astype(jnp.float32)

    # dropout_1 / dropout_2 are identity at inference.
    x_2d = jnp.transpose(x_btE, (1, 0, 2)).reshape(T * B, E).astype(jnp.bfloat16)

    grid_spec = pltpu.PrefetchScalarGridSpec(
        num_scalar_prefetch=0,
        grid=(1,),                                             # whole problem fits VMEM
        in_specs=[
            pl.BlockSpec((T * B, E), lambda i: (0, 0)),        # x (flattened, bf16)
            pl.BlockSpec((B, H), lambda i: (0, 0)),            # h0
            pl.BlockSpec((B, H), lambda i: (0, 0)),            # c0
            pl.BlockSpec((E, 4 * H), lambda i: (0, 0)),        # w_ih (bf16)
            pl.BlockSpec((H, 4 * H), lambda i: (0, 0)),        # w_hh (bf16)
            pl.BlockSpec((1, 4 * H), lambda i: (0, 0)),        # bias (b_ih + b_hh)
            pl.BlockSpec((H, Lp), lambda i: (0, 0)),           # w_proj (padded, bf16)
            pl.BlockSpec((1, Lp), lambda i: (0, 0)),           # b_proj (padded)
        ],
        out_specs=[
            pl.BlockSpec((T * B, Lp), lambda i: (0, 0)),       # logits (lane-dense)
            pl.BlockSpec((B, H), lambda i: (0, 0)),            # h_n
            pl.BlockSpec((B, H), lambda i: (0, 0)),            # c_n
        ],
        scratch_shapes=[pltpu.VMEM((T * B, H), jnp.float32)],  # per-step h stash
    )

    y_2d, h_n, c_n = pl.pallas_call(
        _lstm_proj_kernel,
        out_shape=(
            jax.ShapeDtypeStruct((T * B, Lp), jnp.float32),
            jax.ShapeDtypeStruct((B, H), jnp.float32),
            jax.ShapeDtypeStruct((B, H), jnp.float32),
        ),
        grid_spec=grid_spec,
        compiler_params=pltpu.CompilerParams(
            dimension_semantics=("arbitrary",)),
    )(x_2d, h0, c0, p["w_ih"], p["w_hh"], p["bias"], p["w_proj_p"], p["b_proj_p"])

    logits = jnp.transpose(y_2d.reshape(T, B, Lp)[:, :, :L], (1, 0, 2))  # (B, T, L)
    return logits, (h_n[None], c_n[None])                      # (1, B, H) like PyTorch


def _xavier_uniform(key, shape):
    fan_in, fan_out = shape[0], shape[1]
    limit = jnp.sqrt(6.0 / (fan_in + fan_out))
    return jax.random.uniform(key, shape, jnp.float32, -limit, limit)


def init_params(key, embed_size, hidden_size, label_size):
    """Deterministic synthetic f32 parameters matching the PyTorch module's shapes
    (stored pre-transposed so the kernel does x @ W)."""
    k = jax.random.split(key, 7)
    bound = 1.0 / jnp.sqrt(hidden_size)
    w_ih = _xavier_uniform(k[0], (embed_size, 4 * hidden_size))        # weight_ih_l0.T
    w_hh = _xavier_uniform(k[1], (hidden_size, 4 * hidden_size))       # weight_hh_l0.T
    b_ih = jax.random.uniform(k[2], (4 * hidden_size,), jnp.float32, -bound, bound)
    b_hh = jax.random.uniform(k[3], (4 * hidden_size,), jnp.float32, -bound, bound)
    w_proj = jax.random.uniform(k[4], (hidden_size, label_size), jnp.float32,
                                -bound, bound)                          # proj.weight.T
    b_proj = jax.random.uniform(k[5], (label_size,), jnp.float32, -bound, bound)
    return {
        "w_ih": w_ih,
        "w_hh": w_hh,
        "bias": (b_ih + b_hh)[None, :],
        "w_proj": w_proj,
        "b_proj": b_proj[None, :],
    }


def _reference_forward(x_btE, h0, c0, raw, *, bf16_matmuls):
    """Pure-JAX reference (lax.scan LSTM). bf16_matmuls=True mimics the kernel's
    bf16 MXU operands so a tight tolerance can be used; False is the exact f32
    PyTorch-equivalent math (loose tolerance)."""
    if bf16_matmuls:
        cast = lambda a: a.astype(jnp.bfloat16)
    else:
        cast = lambda a: a
    w_ih, w_hh, w_p = cast(raw["w_ih"]), cast(raw["w_hh"]), cast(raw["w_proj"])

    def step(carry, x_t):
        h, c = carry
        gates = (jnp.dot(cast(x_t), w_ih, preferred_element_type=jnp.float32)
                 + raw["bias"]) + jnp.dot(cast(h), w_hh,
                                          preferred_element_type=jnp.float32)
        H = h.shape[-1]
        i = jax.nn.sigmoid(gates[:, :H])
        f = jax.nn.sigmoid(gates[:, H:2 * H])
        g = jnp.tanh(gates[:, 2 * H:3 * H])
        o = jax.nn.sigmoid(gates[:, 3 * H:])
        c_new = f * c + i * g
        h_new = o * jnp.tanh(c_new)
        y = jnp.dot(cast(h_new), w_p,
                    preferred_element_type=jnp.float32) + raw["b_proj"]
        return (h_new, c_new), y

    (h_n, c_n), ys = jax.lax.scan(step, (h0, c0), jnp.transpose(x_btE, (1, 0, 2)))
    return jnp.transpose(ys, (1, 0, 2)), h_n, c_n


if __name__ == "__main__":
    # cfg: WORD_EMBED_SIZE=32, RNN_HIDDEN_SIZE=32, RNN_LAYER=1, label_size=16
    B, T, E, H, L = 2, 8, 32, 32, 16

    key = jax.random.PRNGKey(0)
    k_x, k_p = jax.random.split(key)
    x = jax.random.normal(k_x, (B, T, E), jnp.float32)
    raw = init_params(k_p, E, H, L)
    prepped = prepare_params(raw)           # one-time: padding + bf16 casts

    fwd = jax.jit(incremental_base_forward, static_argnames=("label_size",))
    logits, (h_n, c_n) = fwd(x, None, prepped, label_size=L)
    logits = jax.block_until_ready(logits)
    h_n = jax.block_until_ready(h_n)
    c_n = jax.block_until_ready(c_n)

    assert logits.shape == (B, T, L)
    assert h_n.shape == (1, B, H) and c_n.shape == (1, B, H)

    z = jnp.zeros((B, H), jnp.float32)
    # Tight check vs. a reference that mimics the kernel's bf16 MXU operands.
    ref_y, ref_h, ref_c = _reference_forward(x, z, z, raw, bf16_matmuls=True)
    assert jnp.allclose(logits, ref_y, atol=2e-3)
    assert jnp.allclose(h_n[0], ref_h, atol=2e-3)
    assert jnp.allclose(c_n[0], ref_c, atol=2e-3)
    # Loose check vs. the exact f32 PyTorch-equivalent math (bf16 operand rounding).
    ref_y32, ref_h32, ref_c32 = _reference_forward(x, z, z, raw, bf16_matmuls=False)
    assert jnp.allclose(logits, ref_y32, atol=5e-2)
    assert jnp.allclose(h_n[0], ref_h32, atol=5e-2)
    assert jnp.allclose(c_n[0], ref_c32, atol=5e-2)

    print("KERNEL_OK")
</pallas_src>

<mosaic_0001>
module attributes {stable_mosaic.version = 11 : i64} {
  func.func @_lstm_proj_kernel(%arg0: i32, %arg1: memref<16x32xbf16, #tpu.memory_space<vmem>>, %arg2: memref<2x32xf32, #tpu.memory_space<vmem>>, %arg3: memref<2x32xf32, #tpu.memory_space<vmem>>, %arg4: memref<32x128xbf16, #tpu.memory_space<vmem>>, %arg5: memref<32x128xbf16, #tpu.memory_space<vmem>>, %arg6: memref<1x128xf32, #tpu.memory_space<vmem>>, %arg7: memref<32x128xbf16, #tpu.memory_space<vmem>>, %arg8: memref<1x128xf32, #tpu.memory_space<vmem>>, %arg9: memref<16x128xf32, #tpu.memory_space<vmem>>, %arg10: memref<2x32xf32, #tpu.memory_space<vmem>>, %arg11: memref<2x32xf32, #tpu.memory_space<vmem>>, %arg12: memref<16x32xf32, #tpu.memory_space<vmem>>) attributes {dimension_semantics = [#tpu.dimension_semantics<arbitrary>], iteration_bounds = array<i64: 1>, scalar_prefetch = 0 : i64, scratch_operands = 1 : i64, tpu.core_type = #tpu.core_type<tc>, window_params = [{pipeline_mode = #tpu.pipeline_mode<synchronous>, transform_indices = @transform_0, window_bounds = array<i64: 16, 32>}, {pipeline_mode = #tpu.pipeline_mode<synchronous>, transform_indices = @transform_1, window_bounds = array<i64: 2, 32>}, {pipeline_mode = #tpu.pipeline_mode<synchronous>, transform_indices = @transform_2, window_bounds = array<i64: 2, 32>}, {pipeline_mode = #tpu.pipeline_mode<synchronous>, transform_indices = @transform_3, window_bounds = array<i64: 32, 128>}, {pipeline_mode = #tpu.pipeline_mode<synchronous>, transform_indices = @transform_4, window_bounds = array<i64: 32, 128>}, {pipeline_mode = #tpu.pipeline_mode<synchronous>, transform_indices = @transform_5, window_bounds = array<i64: 1, 128>}, {pipeline_mode = #tpu.pipeline_mode<synchronous>, transform_indices = @transform_6, window_bounds = array<i64: 32, 128>}, {pipeline_mode = #tpu.pipeline_mode<synchronous>, transform_indices = @transform_7, window_bounds = array<i64: 1, 128>}, {pipeline_mode = #tpu.pipeline_mode<synchronous>, transform_indices = @transform_8, window_bounds = array<i64: 16, 128>}, {pipeline_mode = #tpu.pipeline_mode<synchronous>, transform_indices = @transform_9, window_bounds = array<i64: 2, 32>}, {pipeline_mode = #tpu.pipeline_mode<synchronous>, transform_indices = @transform_10, window_bounds = array<i64: 2, 32>}]} {
    %c0 = arith.constant 0 : index
    %c0_0 = arith.constant 0 : index
    %0 = vector.load %arg5[%c0, %c0_0] : memref<32x128xbf16, #tpu.memory_space<vmem>>, vector<32x128xbf16>
    %c0_1 = arith.constant 0 : index
    %c0_2 = arith.constant 0 : index
    %1 = vector.load %arg1[%c0_1, %c0_2] : memref<16x32xbf16, #tpu.memory_space<vmem>>, vector<16x32xbf16>
    %c0_3 = arith.constant 0 : index
    %c0_4 = arith.constant 0 : index
    %2 = vector.load %arg4[%c0_3, %c0_4] : memref<32x128xbf16, #tpu.memory_space<vmem>>, vector<32x128xbf16>
    %cst = arith.constant dense<0.000000e+00> : vector<16x128xf32>
    %3 = tpu.matmul %1, %2, %cst {dimension_numbers = #tpu.dot_dimension_numbers<[1], [0], [0], [1], [0, 0, 1, 1], [], []>} : vector<16x32xbf16>, vector<32x128xbf16>, vector<16x128xf32> -> vector<16x128xf32>
    %c0_5 = arith.constant 0 : index
    %c0_6 = arith.constant 0 : index
    %4 = vector.load %arg6[%c0_5, %c0_6] : memref<1x128xf32, #tpu.memory_space<vmem>>, vector<1x128xf32>
    %5 = vector.broadcast %4 : vector<1x128xf32> to vector<16x128xf32>
    %6 = arith.addf %3, %5 : vector<16x128xf32>
    %c0_7 = arith.constant 0 : index
    %c0_8 = arith.constant 0 : index
    %7 = vector.load %arg2[%c0_7, %c0_8] : memref<2x32xf32, #tpu.memory_space<vmem>>, vector<2x32xf32>
    %c0_9 = arith.constant 0 : index
    %c0_10 = arith.constant 0 : index
    %8 = vector.load %arg3[%c0_9, %c0_10] : memref<2x32xf32, #tpu.memory_space<vmem>>, vector<2x32xf32>
    %9 = vector.extract_strided_slice %6 {offsets = [0, 0], sizes = [2, 128], strides = [1, 1]} : vector<16x128xf32> to vector<2x128xf32>
    %10 = arith.truncf %7 : vector<2x32xf32> to vector<2x32xbf16>
    %cst_11 = arith.constant dense<0.000000e+00> : vector<2x128xf32>
    %11 = tpu.matmul %10, %0, %cst_11 {dimension_numbers = #tpu.dot_dimension_numbers<[1], [0], [0], [1], [0, 0, 1, 1], [], []>} : vector<2x32xbf16>, vector<32x128xbf16>, vector<2x128xf32> -> vector<2x128xf32>
    %12 = arith.addf %9, %11 : vector<2x128xf32>
    %13 = arith.negf %12 : vector<2x128xf32>
    %14 = math.exp %13 : vector<2x128xf32>
    %cst_12 = arith.constant 1.000000e+00 : f32
    %15 = vector.broadcast %cst_12 : f32 to vector<2x128xf32>
    %16 = arith.addf %15, %14 : vector<2x128xf32>
    %17 = arith.divf %15, %16 : vector<2x128xf32>
    %18 = math.tanh %12 : vector<2x128xf32>
    %19 = vector.extract_strided_slice %17 {offsets = [0, 0], sizes = [2, 32], strides = [1, 1]} : vector<2x128xf32> to vector<2x32xf32>
    %20 = vector.extract_strided_slice %17 {offsets = [0, 32], sizes = [2, 32], strides = [1, 1]} : vector<2x128xf32> to vector<2x32xf32>
    %21 = vector.extract_strided_slice %18 {offsets = [0, 64], sizes = [2, 32], strides = [1, 1]} : vector<2x128xf32> to vector<2x32xf32>
    %22 = vector.extract_strided_slice %17 {offsets = [0, 96], sizes = [2, 32], strides = [1, 1]} : vector<2x128xf32> to vector<2x32xf32>
    %23 = arith.mulf %20, %8 : vector<2x32xf32>
    %24 = arith.mulf %19, %21 : vector<2x32xf32>
    %25 = arith.addf %23, %24 : vector<2x32xf32>
    %26 = math.tanh %25 : vector<2x32xf32>
    %27 = arith.mulf %22, %26 : vector<2x32xf32>
    %c0_13 = arith.constant 0 : index
    %c0_14 = arith.constant 0 : index
    %28 = vector.load %arg12[%c0_13, %c0_14] : memref<16x32xf32, #tpu.memory_space<vmem>>, vector<2x32xf32>
    tpu.vector_store %arg12[%c0_13, %c0_14], %27 {strides = array<i32>} : memref<16x32xf32, #tpu.memory_space<vmem>>, vector<2x32xf32>,
    %29 = vector.extract_strided_slice %6 {offsets = [2, 0], sizes = [2, 128], strides = [1, 1]} : vector<16x128xf32> to vector<2x128xf32>
    %30 = arith.truncf %27 : vector<2x32xf32> to vector<2x32xbf16>
    %cst_15 = arith.constant dense<0.000000e+00> : vector<2x128xf32>
    %31 = tpu.matmul %30, %0, %cst_15 {dimension_numbers = #tpu.dot_dimension_numbers<[1], [0], [0], [1], [0, 0, 1, 1], [], []>} : vector<2x32xbf16>, vector<32x128xbf16>, vector<2x128xf32> -> vector<2x128xf32>
    %32 = arith.addf %29, %31 : vector<2x128xf32>
    %33 = arith.negf %32 : vector<2x128xf32>
    %34 = math.exp %33 : vector<2x128xf32>
    %cst_16 = arith.constant 1.000000e+00 : f32
    %35 = vector.broadcast %cst_16 : f32 to vector<2x128xf32>
    %36 = arith.addf %35, %34 : vector<2x128xf32>
    %37 = arith.divf %35, %36 : vector<2x128xf32>
    %38 = math.tanh %32 : vector<2x128xf32>
    %39 = vector.extract_strided_slice %37 {offsets = [0, 0], sizes = [2, 32], strides = [1, 1]} : vector<2x128xf32> to vector<2x32xf32>
    %40 = vector.extract_strided_slice %37 {offsets = [0, 32], sizes = [2, 32], strides = [1, 1]} : vector<2x128xf32> to vector<2x32xf32>
    %41 = vector.extract_strided_slice %38 {offsets = [0, 64], sizes = [2, 32], strides = [1, 1]} : vector<2x128xf32> to vector<2x32xf32>
    %42 = vector.extract_strided_slice %37 {offsets = [0, 96], sizes = [2, 32], strides = [1, 1]} : vector<2x128xf32> to vector<2x32xf32>
    %43 = arith.mulf %40, %25 : vector<2x32xf32>
    %44 = arith.mulf %39, %41 : vector<2x32xf32>
    %45 = arith.addf %43, %44 : vector<2x32xf32>
    %46 = math.tanh %45 : vector<2x32xf32>
    %47 = arith.mulf %42, %46 : vector<2x32xf32>
    %c2 = arith.constant 2 : index
    %c0_17 = arith.constant 0 : index
    %48 = vector.load %arg12[%c2, %c0_17] : memref<16x32xf32, #tpu.memory_space<vmem>>, vector<2x32xf32>
    tpu.vector_store %arg12[%c2, %c0_17], %47 {strides = array<i32>} : memref<16x32xf32, #tpu.memory_space<vmem>>, vector<2x32xf32>,
    %49 = vector.extract_strided_slice %6 {offsets = [4, 0], sizes = [2, 128], strides = [1, 1]} : vector<16x128xf32> to vector<2x128xf32>
    %50 = arith.truncf %47 : vector<2x32xf32> to vector<2x32xbf16>
    %cst_18 = arith.constant dense<0.000000e+00> : vector<2x128xf32>
    %51 = tpu.matmul %50, %0, %cst_18 {dimension_numbers = #tpu.dot_dimension_numbers<[1], [0], [0], [1], [0, 0, 1, 1], [], []>} : vector<2x32xbf16>, vector<32x128xbf16>, vector<2x128xf32> -> vector<2x128xf32>
    %52 = arith.addf %49, %51 : vector<2x128xf32>
    %53 = arith.negf %52 : vector<2x128xf32>
    %54 = math.exp %53 : vector<2x128xf32>
    %cst_19 = arith.constant 1.000000e+00 : f32
    %55 = vector.broadcast %cst_19 : f32 to vector<2x128xf32>
    %56 = arith.addf %55, %54 : vector<2x128xf32>
    %57 = arith.divf %55, %56 : vector<2x128xf32>
    %58 = math.tanh %52 : vector<2x128xf32>
    %59 = vector.extract_strided_slice %57 {offsets = [0, 0], sizes = [2, 32], strides = [1, 1]} : vector<2x128xf32> to vector<2x32xf32>
    %60 = vector.extract_strided_slice %57 {offsets = [0, 32], sizes = [2, 32], strides = [1, 1]} : vector<2x128xf32> to vector<2x32xf32>
    %61 = vector.extract_strided_slice %58 {offsets = [0, 64], sizes = [2, 32], strides = [1, 1]} : vector<2x128xf32> to vector<2x32xf32>
    %62 = vector.extract_strided_slice %57 {offsets = [0, 96], sizes = [2, 32], strides = [1, 1]} : vector<2x128xf32> to vector<2x32xf32>
    %63 = arith.mulf %60, %45 : vector<2x32xf32>
    %64 = arith.mulf %59, %61 : vector<2x32xf32>
    %65 = arith.addf %63, %64 : vector<2x32xf32>
    %66 = math.tanh %65 : vector<2x32xf32>
    %67 = arith.mulf %62, %66 : vector<2x32xf32>
    %c4 = arith.constant 4 : index
    %c0_20 = arith.constant 0 : index
    %68 = vector.load %arg12[%c4, %c0_20] : memref<16x32xf32, #tpu.memory_space<vmem>>, vector<2x32xf32>
    tpu.vector_store %arg12[%c4, %c0_20], %67 {strides = array<i32>} : memref<16x32xf32, #tpu.memory_space<vmem>>, vector<2x32xf32>,
    %69 = vector.extract_strided_slice %6 {offsets = [6, 0], sizes = [2, 128], strides = [1, 1]} : vector<16x128xf32> to vector<2x128xf32>
    %70 = arith.truncf %67 : vector<2x32xf32> to vector<2x32xbf16>
    %cst_21 = arith.constant dense<0.000000e+00> : vector<2x128xf32>
    %71 = tpu.matmul %70, %0, %cst_21 {dimension_numbers = #tpu.dot_dimension_numbers<[1], [0], [0], [1], [0, 0, 1, 1], [], []>} : vector<2x32xbf16>, vector<32x128xbf16>, vector<2x128xf32> -> vector<2x128xf32>
    %72 = arith.addf %69, %71 : vector<2x128xf32>
    %73 = arith.negf %72 : vector<2x128xf32>
    %74 = math.exp %73 : vector<2x128xf32>
    %cst_22 = arith.constant 1.000000e+00 : f32
    %75 = vector.broadcast %cst_22 : f32 to vector<2x128xf32>
    %76 = arith.addf %75, %74 : vector<2x128xf32>
    %77 = arith.divf %75, %76 : vector<2x128xf32>
    %78 = math.tanh %72 : vector<2x128xf32>
    %79 = vector.extract_strided_slice %77 {offsets = [0, 0], sizes = [2, 32], strides = [1, 1]} : vector<2x128xf32> to vector<2x32xf32>
    %80 = vector.extract_strided_slice %77 {offsets = [0, 32], sizes = [2, 32], strides = [1, 1]} : vector<2x128xf32> to vector<2x32xf32>
    %81 = vector.extract_strided_slice %78 {offsets = [0, 64], sizes = [2, 32], strides = [1, 1]} : vector<2x128xf32> to vector<2x32xf32>
    %82 = vector.extract_strided_slice %77 {offsets = [0, 96], sizes = [2, 32], strides = [1, 1]} : vector<2x128xf32> to vector<2x32xf32>
    %83 = arith.mulf %80, %65 : vector<2x32xf32>
    %84 = arith.mulf %79, %81 : vector<2x32xf32>
    %85 = arith.addf %83, %84 : vector<2x32xf32>
    %86 = math.tanh %85 : vector<2x32xf32>
    %87 = arith.mulf %82, %86 : vector<2x32xf32>
    %c6 = arith.constant 6 : index
    %c0_23 = arith.constant 0 : index
    %88 = vector.load %arg12[%c6, %c0_23] : memref<16x32xf32, #tpu.memory_space<vmem>>, vector<2x32xf32>
    tpu.vector_store %arg12[%c6, %c0_23], %87 {strides = array<i32>} : memref<16x32xf32, #tpu.memory_space<vmem>>, vector<2x32xf32>,
    %89 = vector.extract_strided_slice %6 {offsets = [8, 0], sizes = [2, 128], strides = [1, 1]} : vector<16x128xf32> to vector<2x128xf32>
    %90 = arith.truncf %87 : vector<2x32xf32> to vector<2x32xbf16>
    %cst_24 = arith.constant dense<0.000000e+00> : vector<2x128xf32>
    %91 = tpu.matmul %90, %0, %cst_24 {dimension_numbers = #tpu.dot_dimension_numbers<[1], [0], [0], [1], [0, 0, 1, 1], [], []>} : vector<2x32xbf16>, vector<32x128xbf16>, vector<2x128xf32> -> vector<2x128xf32>
    %92 = arith.addf %89, %91 : vector<2x128xf32>
    %93 = arith.negf %92 : vector<2x128xf32>
    %94 = math.exp %93 : vector<2x128xf32>
    %cst_25 = arith.constant 1.000000e+00 : f32
    %95 = vector.broadcast %cst_25 : f32 to vector<2x128xf32>
    %96 = arith.addf %95, %94 : vector<2x128xf32>
    %97 = arith.divf %95, %96 : vector<2x128xf32>
    %98 = math.tanh %92 : vector<2x128xf32>
    %99 = vector.extract_strided_slice %97 {offsets = [0, 0], sizes = [2, 32], strides = [1, 1]} : vector<2x128xf32> to vector<2x32xf32>
    %100 = vector.extract_strided_slice %97 {offsets = [0, 32], sizes = [2, 32], strides = [1, 1]} : vector<2x128xf32> to vector<2x32xf32>
    %101 = vector.extract_strided_slice %98 {offsets = [0, 64], sizes = [2, 32], strides = [1, 1]} : vector<2x128xf32> to vector<2x32xf32>
    %102 = vector.extract_strided_slice %97 {offsets = [0, 96], sizes = [2, 32], strides = [1, 1]} : vector<2x128xf32> to vector<2x32xf32>
    %103 = arith.mulf %100, %85 : vector<2x32xf32>
    %104 = arith.mulf %99, %101 : vector<2x32xf32>
    %105 = arith.addf %103, %104 : vector<2x32xf32>
    %106 = math.tanh %105 : vector<2x32xf32>
    %107 = arith.mulf %102, %106 : vector<2x32xf32>
    %c8 = arith.constant 8 : index
    %c0_26 = arith.constant 0 : index
    %108 = vector.load %arg12[%c8, %c0_26] : memref<16x32xf32, #tpu.memory_space<vmem>>, vector<2x32xf32>
    tpu.vector_store %arg12[%c8, %c0_26], %107 {strides = array<i32>} : memref<16x32xf32, #tpu.memory_space<vmem>>, vector<2x32xf32>,
    %109 = vector.extract_strided_slice %6 {offsets = [10, 0], sizes = [2, 128], strides = [1, 1]} : vector<16x128xf32> to vector<2x128xf32>
    %110 = arith.truncf %107 : vector<2x32xf32> to vector<2x32xbf16>
    %cst_27 = arith.constant dense<0.000000e+00> : vector<2x128xf32>
    %111 = tpu.matmul %110, %0, %cst_27 {dimension_numbers = #tpu.dot_dimension_numbers<[1], [0], [0], [1], [0, 0, 1, 1], [], []>} : vector<2x32xbf16>, vector<32x128xbf16>, vector<2x128xf32> -> vector<2x128xf32>
    %112 = arith.addf %109, %111 : vector<2x128xf32>
    %113 = arith.negf %112 : vector<2x128xf32>
    %114 = math.exp %113 : vector<2x128xf32>
    %cst_28 = arith.constant 1.000000e+00 : f32
    %115 = vector.broadcast %cst_28 : f32 to vector<2x128xf32>
    %116 = arith.addf %115, %114 : vector<2x128xf32>
    %117 = arith.divf %115, %116 : vector<2x128xf32>
    %118 = math.tanh %112 : vector<2x128xf32>
    %119 = vector.extract_strided_slice %117 {offsets = [0, 0], sizes = [2, 32], strides = [1, 1]} : vector<2x128xf32> to vector<2x32xf32>
    %120 = vector.extract_strided_slice %117 {offsets = [0, 32], sizes = [2, 32], strides = [1, 1]} : vector<2x128xf32> to vector<2x32xf32>
    %121 = vector.extract_strided_slice %118 {offsets = [0, 64], sizes = [2, 32], strides = [1, 1]} : vector<2x128xf32> to vector<2x32xf32>
    %122 = vector.extract_strided_slice %117 {offsets = [0, 96], sizes = [2, 32], strides = [1, 1]} : vector<2x128xf32> to vector<2x32xf32>
    %123 = arith.mulf %120, %105 : vector<2x32xf32>
    %124 = arith.mulf %119, %121 : vector<2x32xf32>
    %125 = arith.addf %123, %124 : vector<2x32xf32>
    %126 = math.tanh %125 : vector<2x32xf32>
    %127 = arith.mulf %122, %126 : vector<2x32xf32>
    %c10 = arith.constant 10 : index
    %c0_29 = arith.constant 0 : index
    %128 = vector.load %arg12[%c10, %c0_29] : memref<16x32xf32, #tpu.memory_space<vmem>>, vector<2x32xf32>
    tpu.vector_store %arg12[%c10, %c0_29], %127 {strides = array<i32>} : memref<16x32xf32, #tpu.memory_space<vmem>>, vector<2x32xf32>,
    %129 = vector.extract_strided_slice %6 {offsets = [12, 0], sizes = [2, 128], strides = [1, 1]} : vector<16x128xf32> to vector<2x128xf32>
    %130 = arith.truncf %127 : vector<2x32xf32> to vector<2x32xbf16>
    %cst_30 = arith.constant dense<0.000000e+00> : vector<2x128xf32>
    %131 = tpu.matmul %130, %0, %cst_30 {dimension_numbers = #tpu.dot_dimension_numbers<[1], [0], [0], [1], [0, 0, 1, 1], [], []>} : vector<2x32xbf16>, vector<32x128xbf16>, vector<2x128xf32> -> vector<2x128xf32>
    %132 = arith.addf %129, %131 : vector<2x128xf32>
    %133 = arith.negf %132 : vector<2x128xf32>
    %134 = math.exp %133 : vector<2x128xf32>
    %cst_31 = arith.constant 1.000000e+00 : f32
    %135 = vector.broadcast %cst_31 : f32 to vector<2x128xf32>
    %136 = arith.addf %135, %134 : vector<2x128xf32>
    %137 = arith.divf %135, %136 : vector<2x128xf32>
    %138 = math.tanh %132 : vector<2x128xf32>
    %139 = vector.extract_strided_slice %137 {offsets = [0, 0], sizes = [2, 32], strides = [1, 1]} : vector<2x128xf32> to vector<2x32xf32>
    %140 = vector.extract_strided_slice %137 {offsets = [0, 32], sizes = [2, 32], strides = [1, 1]} : vector<2x128xf32> to vector<2x32xf32>
    %141 = vector.extract_strided_slice %138 {offsets = [0, 64], sizes = [2, 32], strides = [1, 1]} : vector<2x128xf32> to vector<2x32xf32>
    %142 = vector.extract_strided_slice %137 {offsets = [0, 96], sizes = [2, 32], strides = [1, 1]} : vector<2x128xf32> to vector<2x32xf32>
    %143 = arith.mulf %140, %125 : vector<2x32xf32>
    %144 = arith.mulf %139, %141 : vector<2x32xf32>
    %145 = arith.addf %143, %144 : vector<2x32xf32>
    %146 = math.tanh %145 : vector<2x32xf32>
    %147 = arith.mulf %142, %146 : vector<2x32xf32>
    %c12 = arith.constant 12 : index
    %c0_32 = arith.constant 0 : index
    %148 = vector.load %arg12[%c12, %c0_32] : memref<16x32xf32, #tpu.memory_space<vmem>>, vector<2x32xf32>
    tpu.vector_store %arg12[%c12, %c0_32], %147 {strides = array<i32>} : memref<16x32xf32, #tpu.memory_space<vmem>>, vector<2x32xf32>,
    %149 = vector.extract_strided_slice %6 {offsets = [14, 0], sizes = [2, 128], strides = [1, 1]} : vector<16x128xf32> to vector<2x128xf32>
    %150 = arith.truncf %147 : vector<2x32xf32> to vector<2x32xbf16>
    %cst_33 = arith.constant dense<0.000000e+00> : vector<2x128xf32>
    %151 = tpu.matmul %150, %0, %cst_33 {dimension_numbers = #tpu.dot_dimension_numbers<[1], [0], [0], [1], [0, 0, 1, 1], [], []>} : vector<2x32xbf16>, vector<32x128xbf16>, vector<2x128xf32> -> vector<2x128xf32>
    %152 = arith.addf %149, %151 : vector<2x128xf32>
    %153 = arith.negf %152 : vector<2x128xf32>
    %154 = math.exp %153 : vector<2x128xf32>
    %cst_34 = arith.constant 1.000000e+00 : f32
    %155 = vector.broadcast %cst_34 : f32 to vector<2x128xf32>
    %156 = arith.addf %155, %154 : vector<2x128xf32>
    %157 = arith.divf %155, %156 : vector<2x128xf32>
    %158 = math.tanh %152 : vector<2x128xf32>
    %159 = vector.extract_strided_slice %157 {offsets = [0, 0], sizes = [2, 32], strides = [1, 1]} : vector<2x128xf32> to vector<2x32xf32>
    %160 = vector.extract_strided_slice %157 {offsets = [0, 32], sizes = [2, 32], strides = [1, 1]} : vector<2x128xf32> to vector<2x32xf32>
    %161 = vector.extract_strided_slice %158 {offsets = [0, 64], sizes = [2, 32], strides = [1, 1]} : vector<2x128xf32> to vector<2x32xf32>
    %162 = vector.extract_strided_slice %157 {offsets = [0, 96], sizes = [2, 32], strides = [1, 1]} : vector<2x128xf32> to vector<2x32xf32>
    %163 = arith.mulf %160, %145 : vector<2x32xf32>
    %164 = arith.mulf %159, %161 : vector<2x32xf32>
    %165 = arith.addf %163, %164 : vector<2x32xf32>
    %166 = math.tanh %165 : vector<2x32xf32>
    %167 = arith.mulf %162, %166 : vector<2x32xf32>
    %c14 = arith.constant 14 : index
    %c0_35 = arith.constant 0 : index
    %168 = vector.load %arg12[%c14, %c0_35] : memref<16x32xf32, #tpu.memory_space<vmem>>, vector<2x32xf32>
    tpu.vector_store %arg12[%c14, %c0_35], %167 {strides = array<i32>} : memref<16x32xf32, #tpu.memory_space<vmem>>, vector<2x32xf32>,
    %c0_36 = arith.constant 0 : index
    %c0_37 = arith.constant 0 : index
    %169 = vector.load %arg10[%c0_36, %c0_37] : memref<2x32xf32, #tpu.memory_space<vmem>>, vector<2x32xf32>
    tpu.vector_store %arg10[%c0_36, %c0_37], %167 {strides = array<i32>} : memref<2x32xf32, #tpu.memory_space<vmem>>, vector<2x32xf32>,
    %c0_38 = arith.constant 0 : index
    %c0_39 = arith.constant 0 : index
    %170 = vector.load %arg11[%c0_38, %c0_39] : memref<2x32xf32, #tpu.memory_space<vmem>>, vector<2x32xf32>
    tpu.vector_store %arg11[%c0_38, %c0_39], %165 {strides = array<i32>} : memref<2x32xf32, #tpu.memory_space<vmem>>, vector<2x32xf32>,
    %c0_40 = arith.constant 0 : index
    %c0_41 = arith.constant 0 : index
    %171 = vector.load %arg12[%c0_40, %c0_41] : memref<16x32xf32, #tpu.memory_space<vmem>>, vector<16x32xf32>
    %172 = arith.truncf %171 : vector<16x32xf32> to vector<16x32xbf16>
    %c0_42 = arith.constant 0 : index
    %c0_43 = arith.constant 0 : index
    %173 = vector.load %arg7[%c0_42, %c0_43] : memref<32x128xbf16, #tpu.memory_space<vmem>>, vector<32x128xbf16>
    %cst_44 = arith.constant dense<0.000000e+00> : vector<16x128xf32>
    %174 = tpu.matmul %172, %173, %cst_44 {dimension_numbers = #tpu.dot_dimension_numbers<[1], [0], [0], [1], [0, 0, 1, 1], [], []>} : vector<16x32xbf16>, vector<32x128xbf16>, vector<16x128xf32> -> vector<16x128xf32>
    %c0_45 = arith.constant 0 : index
    %c0_46 = arith.constant 0 : index
    %175 = vector.load %arg8[%c0_45, %c0_46] : memref<1x128xf32, #tpu.memory_space<vmem>>, vector<1x128xf32>
    %176 = vector.broadcast %175 : vector<1x128xf32> to vector<16x128xf32>
    %177 = arith.addf %174, %176 : vector<16x128xf32>
    %c0_47 = arith.constant 0 : index
    %c0_48 = arith.constant 0 : index
    %178 = vector.load %arg9[%c0_47, %c0_48] : memref<16x128xf32, #tpu.memory_space<vmem>>, vector<16x128xf32>
    tpu.vector_store %arg9[%c0_47, %c0_48], %177 {strides = array<i32>} : memref<16x128xf32, #tpu.memory_space<vmem>>, vector<16x128xf32>,
    return
  }
  func.func @transform_0(%arg0: i32) -> (i32, i32) {
    %c0_i32 = arith.constant 0 : i32
    %c0_i32_0 = arith.constant 0 : i32
    %c0_i32_1 = arith.constant 0 : i32
    return %c0_i32, %c0_i32_0 : i32, i32
  }
  func.func @transform_1(%arg0: i32) -> (i32, i32) {
    %c0_i32 = arith.constant 0 : i32
    %c0_i32_0 = arith.constant 0 : i32
    %c0_i32_1 = arith.constant 0 : i32
    return %c0_i32, %c0_i32_0 : i32, i32
  }
  func.func @transform_2(%arg0: i32) -> (i32, i32) {
    %c0_i32 = arith.constant 0 : i32
    %c0_i32_0 = arith.constant 0 : i32
    %c0_i32_1 = arith.constant 0 : i32
    return %c0_i32, %c0_i32_0 : i32, i32
  }
  func.func @transform_3(%arg0: i32) -> (i32, i32) {
    %c0_i32 = arith.constant 0 : i32
    %c0_i32_0 = arith.constant 0 : i32
    %c0_i32_1 = arith.constant 0 : i32
    return %c0_i32, %c0_i32_0 : i32, i32
  }
  func.func @transform_4(%arg0: i32) -> (i32, i32) {
    %c0_i32 = arith.constant 0 : i32
    %c0_i32_0 = arith.constant 0 : i32
    %c0_i32_1 = arith.constant 0 : i32
    return %c0_i32, %c0_i32_0 : i32, i32
  }
  func.func @transform_5(%arg0: i32) -> (i32, i32) {
    %c0_i32 = arith.constant 0 : i32
    %c0_i32_0 = arith.constant 0 : i32
    %c0_i32_1 = arith.constant 0 : i32
    return %c0_i32, %c0_i32_0 : i32, i32
  }
  func.func @transform_6(%arg0: i32) -> (i32, i32) {
    %c0_i32 = arith.constant 0 : i32
    %c0_i32_0 = arith.constant 0 : i32
    %c0_i32_1 = arith.constant 0 : i32
    return %c0_i32, %c0_i32_0 : i32, i32
  }
  func.func @transform_7(%arg0: i32) -> (i32, i32) {
    %c0_i32 = arith.constant 0 : i32
    %c0_i32_0 = arith.constant 0 : i32
    %c0_i32_1 = arith.constant 0 : i32
    return %c0_i32, %c0_i32_0 : i32, i32
  }
  func.func @transform_8(%arg0: i32) -> (i32, i32) {
    %c0_i32 = arith.constant 0 : i32
    %c0_i32_0 = arith.constant 0 : i32
    %c0_i32_1 = arith.constant 0 : i32
    return %c0_i32, %c0_i32_0 : i32, i32
  }
  func.func @transform_9(%arg0: i32) -> (i32, i32) {
    %c0_i32 = arith.constant 0 : i32
    %c0_i32_0 = arith.constant 0 : i32
    %c0_i32_1 = arith.constant 0 : i32
    return %c0_i32, %c0_i32_0 : i32, i32
  }
  func.func @transform_10(%arg0: i32) -> (i32, i32) {
    %c0_i32 = arith.constant 0 : i32
    %c0_i32_0 = arith.constant 0 : i32
    %c0_i32_1 = arith.constant 0 : i32
    return %c0_i32, %c0_i32_0 : i32, i32
  }
}

</mosaic_0001>

<bundles_post_ra>
// kernel: incremental_base_forward.1
= control target key start
LH: loop header
LB: loop body
LE: loop exit
PB: predicated region body
PF: predicated region fallthrough
CT: control target
= control target key end

     0   :  { %16 = vsyncpa [#allocation4], 0  ;;  %v1166_v1 = vmov 0.0   ;;  %vm1167_vm0 = vmmov 0   ;;  %vm69_vm1 = vcmask 261120   ;;  %s1447_s0 = inlined_call_operand.vmem [shape: bf16[16,32], index: 0, kind: input, shape index: {}]   ;;  %s1448_s1 = inlined_call_operand.vmem [shape: f32[2,32], index: 1, kind: input, shape index: {}, may-alias: {1,2}]   ;;  %s1449_s2 = inlined_call_operand.vmem [shape: f32[2,32], index: 2, kind: input, shape index: {}, may-alias: {1,2}]   ;;  %s1450_s3 = inlined_call_operand.vmem [shape: bf16[32,128], index: 3, kind: input, shape index: {}]   ;;  %s1451_s4 = inlined_call_operand.vmem [shape: bf16[32,128], index: 4, kind: input, shape index: {}]   ;;  %s1452_s5 = inlined_call_operand.vmem [shape: f32[1,128], index: 5, kind: input, shape index: {}]   ;;  %s1453_s6 = inlined_call_operand.vmem [shape: bf16[32,128], index: 6, kind: input, shape index: {}]   ;;  %s1454_s7 = inlined_call_operand.vmem [shape: f32[1,128], index: 7, kind: input, shape index: {}]   ;;  %s1455_s8 = inlined_call_operand.vmem [shape: f32[16,128], index: 8, kind: output, shape index: {0}]   ;;  %s1456_s9 = inlined_call_operand.hbm [shape: f32[2,32], index: 9, kind: output, shape index: {1}]   ;;  %s1457_s10 = inlined_call_operand.hbm [shape: f32[2,32], index: 10, kind: output, shape index: {2}]  }
   0x1   :  { %v1047_v0 = vld [vmem:[%s1450_s3] sm:$0xff]   ;;  %960 = vmatprep.subr.bf16.mxu0 %v1166_v1  ;;  %968 = vmatprep.subr.bf16.mxu1 %v1166_v1  ;;  %v1049_v3 = vld [vmem:[%s1450_s3 + $0x8] sm:$0xff]  }
   0x2   :  { %v1236_v2 = vld [vmem:[%s1451_s4] sm:$0xff]   ;;  %961 = vmatpush3.bf16.msra.mxu0 %v1047_v0  ;;  %964 = vmatprep.mubr.msk.bf16.mxu0 %vm1167_vm0, %v1166_v1  ;;  %v1248_v4 = vld [vmem:[%s1451_s4 + $0x8] sm:$0xff]  }
   0x3   :  { %969 = vmatpush3.bf16.msra.mxu1 %v1236_v2  ;;  %962 = vmatprep.subr.bf16.mxu0 %v1166_v1  ;;  %v1051_v5 = vld [vmem:[%s1447_s0] sm:$0xff]  }
   0x4   :  { %970 = vmatprep.subr.bf16.mxu1 %v1166_v1  ;;  %972 = vmatprep.mubr.msk.bf16.mxu1 %vm1167_vm0, %v1166_v1  ;;  %v114_v6 = vld [vmem:[%s1448_s1] sm:$0x3] }
   0x5   :  { %v116_v7 = vpack.c.bf16 %v114_v6, %v114_v6 }
   0x6   :  { %963 = vmatpush3.bf16.msra.mxu0 %v1049_v3 }
   0x7   :  { %971 = vmatpush3.bf16.msra.mxu1 %v1248_v4  ;;  %976 = vmatprep.subr.bf16.mxu0 %v1166_v1 }
   0x8   :  { %17 = vsyncpa [#allocation6], 0  ;;  %984 = vmatprep.subr.bf16.mxu1 %v1166_v1  ;;  %v903_v8 = vld [vmem:[%s1452_s5] ss:$0 sm:$0xff]  ;;  %s1168_s4 = smov 64   ;;  %s1169_s25 = smov 32  }
   0x9   :  { %965 = vmatmul.mubr.msk.bf16.vlgmr.msra.gmra.mrb[0].mxu0 %vm69_vm1, %v1051_v5  ;;  %v115_v21 = vld [vmem:[%s1449_s2] sm:$0x3]  ;;  %vm205_vm2 = vcmask 254976   ;;  %s1170_s2 = smov 96   ;;  %vm374_vm3 = vcmask 259076   ;;  %vm459_vm4 = vcmask 261126  }
   0xa   :  { %973 = vmatmul.mubr.msk.bf16.vlgmr.msra.gmra.mrb[0].mxu1 %vm69_vm1, %v116_v7  ;;  %977 = vmatpush3.bf16.msra.mxu0 %v1236_v2  ;;  %vm289_vm5 = vcmask 257026   ;;  %s1172_s11 = smov [#allocation5]  }
   0xb   :  { %978 = vmatprep.subr.bf16.mxu0 %v1166_v1  ;;  %980 = vmatprep.mubr.msk.bf16.mxu0 %vm1167_vm0, %v1166_v1  ;;  %s889_s12 = sshll.u32 %s1172_s11, 4  ;;  %s890_s12 = int_to_ptr.vmem [resolvable:$true] %s889_s12 }
   0xc   :  { %985 = vmatpush3.bf16.msra.mxu1 %v1236_v2  ;;  %988 = vmatprep.mubr.msk.bf16.mxu1 %vm1167_vm0, %v1166_v1 }
   0xd   :  { %986 = vmatprep.subr.bf16.mxu1 %v1166_v1 }
   0xe   :  { %979 = vmatpush3.bf16.msra.mxu0 %v1248_v4 }
   0xf   :  { %992 = vmatprep.subr.bf16.mxu0 %v1166_v1 }
  0x10   :  { %987 = vmatpush3.bf16.msra.mxu1 %v1248_v4 }
  0x11   :  { %1000 = vmatprep.subr.bf16.mxu1 %v1166_v1 }
  0xdc   :  { %v107_v9 = vpop.f32.mrb[0].mxu0 }
  0xdd   :  { %v1279_v10 = vadd.f32 %v903_v8, %v107_v9  ;;  %v166_v11 = vpop.f32.mrb[0].mxu1  ;;  %v966_v12 = vpop.f32.mrb[1].mxu0 }
  0xde   :  { %v974_v13 = vpop.f32.mrb[1].mxu1  ;;  %v110_v14 = vpop.f32.mrb[2].mxu0 }
  0xdf   :  { %v172_v15 = vadd.f32 %v166_v11, %v1279_v10  ;;  %v1282_v16 = vadd.f32 %v903_v8, %v110_v14  ;;  %v169_v17 = vpop.f32.mrb[2].mxu1  ;;  %v967_v18 = vpop.f32.mrb[3].mxu0 }
  0xe0   :  { %v975_v19 = vpop.f32.mrb[3].mxu1 }
  0xe1   :  { %1054 = vtanh.f32 %v172_v15  ;;  %v911_v22 = vmul.f32 -1.442695, %v172_v15 }
  0xe3   :  { %1056 = vpow2.f32 %v911_v22 }
  0xeb   :  { %v1055_v20 = vpop.eup %1054 }
  0xec   :  { %186 = vrot.lane.b32.xlu0 %v1055_v20, %s1168_s4 }
  0xed   :  { %v1057_v23 = vpop.eup %1056 }
  0xee   :  { %v176_v24 = vadd.f32 1.0, %v1057_v23 }
  0xf0   :  { %181 = vrot.lane.b32.xlu0 %v115_v21, %s1169_s25  ;;  %1058 = vrcp.f32 %v176_v24 }
  0xfa   :  { %v1059_v25 = vpop.eup %1058 }
 0x15e   :  { %v187_v26 = vpop.permute.xlu0 %186 }
 0x15f   :  { %v189_v27 = vmul.f32 %v1059_v25, %v187_v26 }
 0x161   :  { %191 = vrot.lane.b32.xlu1 %v189_v27, %s1169_s25 }
 0x162   :  { %v182_v28 = vpop.permute.xlu0 %181 }
 0x163   :  { %v184_v29 = vmul.f32 %v1059_v25, %v182_v28 }
 0x1d3   :  { %v192_v30 = vpop.permute.xlu1 %191 }
 0x1d4   :  { %v194_v31 = vadd.f32 %v192_v30, %v184_v29 }
 0x1d6   :  { %1060 = vtanh.f32 %v194_v31  ;;  %v266_v50 = vrot.slane %v194_v31, 6 }
 0x1e0   :  { %v1061_v32 = vpop.eup %1060 }
 0x1e1   :  { %197 = vrot.lane.b32.xlu1 %v1061_v32, %s1168_s4 }
 0x253   :  { %v198_v33 = vpop.permute.xlu1 %197 }
 0x254   :  { %v1291_v34 = vmul.f32 %v1059_v25, %v198_v33 }
 0x256   :  { %v207_v35 = vpack.c.bf16 %v1291_v34, %v1291_v34 }
 0x258   :  { %209 = vrot.lane.b32.xlu0 %v207_v35, %s1169_s25 }
 0x2ca   :  { %v210_v36 = vpop.permute.xlu0 %209 }
 0x2cb   :  { %981 = vmatmul.mubr.msk.bf16.vlgmr.msra.gmra.mrb[4].mxu0 %vm69_vm1, %v210_v36 }
 0x2cc   :  { %993 = vmatpush3.bf16.msra.mxu0 %v1236_v2  ;;  %996 = vmatprep.mubr.msk.bf16.mxu0 %vm1167_vm0, %v1166_v1 }
 0x2cd   :  { %994 = vmatprep.subr.bf16.mxu0 %v1166_v1 }
 0x2d0   :  { %995 = vmatpush3.bf16.msra.mxu0 %v1248_v4 }
 0x2d1   :  { %1008 = vmatprep.subr.bf16.mxu0 %v1166_v1 }
 0x39e   :  { %v248_v37 = vpop.f32.mrb[4].mxu0 }
 0x39f   :  { %v255_v38 = vrot.slane %v248_v37, 6  ;;  %v982_v39 = vpop.f32.mrb[5].mxu0 }
 0x3a0   :  { %v251_v40 = vpop.f32.mrb[6].mxu0 }
 0x3a1   :  { %v257_v41 = vadd.f32 %v255_v38, %v1279_v10  ;;  %v983_v42 = vpop.f32.mrb[7].mxu0 }
 0x3a3   :  { %1062 = vtanh.f32 %v257_v41  ;;  %v913_v44 = vmul.f32 -1.442695, %v257_v41 }
 0x3a5   :  { %1064 = vpow2.f32 %v913_v44 }
 0x3ad   :  { %v1063_v43 = vpop.eup %1062 }
 0x3ae   :  { %270 = vrot.lane.b32.xlu1 %v1063_v43, %s1168_s4 }
 0x3af   :  { %v1065_v45 = vpop.eup %1064 }
 0x3b0   :  { %v261_v46 = vadd.f32 1.0, %v1065_v45 }
 0x3b2   :  { %1066 = vrcp.f32 %v261_v46 }
 0x3bc   :  { %v1067_v47 = vpop.eup %1066 }
 0x3bd   :  { %v268_v51 = vmul.f32 %v1067_v47, %v266_v50 }
 0x420   :  { %v271_v48 = vpop.permute.xlu1 %270 }
 0x421   :  { %v273_v49 = vmul.f32 %v1067_v47, %v271_v48 }
 0x423   :  { %275 = vrot.lane.b32.xlu0 %v273_v49, %s1169_s25 }
 0x495   :  { %v276_v52 = vpop.permute.xlu0 %275 }
 0x496   :  { %v278_v53 = vadd.f32 %v276_v52, %v268_v51 }
 0x498   :  { %1068 = vtanh.f32 %v278_v53  ;;  %v351_v13 = vrot.slane %v278_v53, 6 }
 0x4a2   :  { %v1069_v54 = vpop.eup %1068 }
 0x4a3   :  { %281 = vrot.lane.b32.xlu1 %v1069_v54, %s1168_s4 }
 0x515   :  { %v282_v55 = vpop.permute.xlu1 %281 }
 0x516   :  { %v1307_v56 = vmul.f32 %v1067_v47, %v282_v55 }
 0x518   :  { %v291_v57 = vpack.c.bf16 %v1307_v56, %v1307_v56 }
 0x51a   :  { %v293_v58 = vrot.slane %v291_v57, 1 }
 0x51c   :  { %294 = vrot.lane.b32.xlu0 %v293_v58, %s1169_s25 }
 0x58e   :  { %v295_v59 = vpop.permute.xlu0 %294 }
 0x58f   :  { %989 = vmatmul.mubr.msk.bf16.vlgmr.msra.gmra.mrb[4].mxu1 %vm69_vm1, %v295_v59 }
 0x590   :  { %1001 = vmatpush3.bf16.msra.mxu1 %v1236_v2  ;;  %1004 = vmatprep.mubr.msk.bf16.mxu1 %vm1167_vm0, %v1166_v1 }
 0x591   :  { %1002 = vmatprep.subr.bf16.mxu1 %v1166_v1 }
 0x594   :  { %1003 = vmatpush3.bf16.msra.mxu1 %v1248_v4 }
 0x595   :  { %1016 = vmatprep.subr.bf16.mxu1 %v1166_v1 }
 0x662   :  { %v333_v60 = vpop.f32.mrb[4].mxu1 }
 0x663   :  { %v340_v61 = vrot.slane %v333_v60, 4  ;;  %v990_v62 = vpop.f32.mrb[5].mxu1 }
 0x664   :  { %v336_v63 = vpop.f32.mrb[6].mxu1 }
 0x665   :  { %v342_v0 = vadd.f32 %v340_v61, %v1279_v10  ;;  %v991_v3 = vpop.f32.mrb[7].mxu1 }
 0x667   :  { %1070 = vtanh.f32 %v342_v0  ;;  %v915_v6 = vmul.f32 -1.442695, %v342_v0 }
 0x669   :  { %1072 = vpow2.f32 %v915_v6 }
 0x671   :  { %v1071_v5 = vpop.eup %1070 }
 0x672   :  { %355 = vrot.lane.b32.xlu1 %v1071_v5, %s1168_s4 }
 0x673   :  { %v1073_v7 = vpop.eup %1072 }
 0x674   :  { %v346_v8 = vadd.f32 1.0, %v1073_v7 }
 0x676   :  { %1074 = vrcp.f32 %v346_v8 }
 0x680   :  { %v1075_v9 = vpop.eup %1074 }
 0x681   :  { %v353_v14 = vmul.f32 %v1075_v9, %v351_v13 }
 0x6e4   :  { %v356_v11 = vpop.permute.xlu1 %355 }
 0x6e5   :  { %v358_v12 = vmul.f32 %v1075_v9, %v356_v11 }
 0x6e7   :  { %360 = vrot.lane.b32.xlu0 %v358_v12, %s1169_s25 }
 0x759   :  { %v361_v15 = vpop.permute.xlu0 %360 }
 0x75a   :  { %v363_v17 = vadd.f32 %v361_v15, %v353_v14 }
 0x75c   :  { %1076 = vtanh.f32 %v363_v17  ;;  %v436_v38 = vrot.slane %v363_v17, 6 }
 0x766   :  { %v1077_v18 = vpop.eup %1076 }
 0x767   :  { %366 = vrot.lane.b32.xlu1 %v1077_v18, %s1168_s4 }
 0x7d9   :  { %v367_v19 = vpop.permute.xlu1 %366 }
 0x7da   :  { %v1323_v20 = vmul.f32 %v1075_v9, %v367_v19 }
 0x7dc   :  { %v376_v21 = vpack.c.bf16 %v1323_v20, %v1323_v20 }
 0x7de   :  { %v378_v22 = vrot.slane %v376_v21, 2 }
 0x7e0   :  { %379 = vrot.lane.b32.xlu0 %v378_v22, %s1169_s25 }
 0x852   :  { %v380_v23 = vpop.permute.xlu0 %379 }
 0x853   :  { %997 = vmatmul.mubr.msk.bf16.vlgmr.msra.gmra.mrb[8].mxu0 %vm69_vm1, %v380_v23 }
 0x854   :  { %1009 = vmatpush3.bf16.msra.mxu0 %v1236_v2  ;;  %1012 = vmatprep.mubr.msk.bf16.mxu0 %vm1167_vm0, %v1166_v1 }
 0x855   :  { %1010 = vmatprep.subr.bf16.mxu0 %v1166_v1 }
 0x858   :  { %1011 = vmatpush3.bf16.msra.mxu0 %v1248_v4 }
 0x859   :  { %1024 = vmatprep.subr.bf16.mxu0 %v1166_v1 }
 0x926   :  { %v418_v24 = vpop.f32.mrb[8].mxu0 }
 0x927   :  { %v425_v25 = vrot.slane %v418_v24, 2  ;;  %v998_v26 = vpop.f32.mrb[9].mxu0 }
 0x928   :  { %v421_v27 = vpop.f32.mrb[10].mxu0 }
 0x929   :  { %v427_v28 = vadd.f32 %v425_v25, %v1279_v10  ;;  %v999_v29 = vpop.f32.mrb[11].mxu0 }
 0x92b   :  { %1078 = vtanh.f32 %v427_v28  ;;  %v917_v31 = vmul.f32 -1.442695, %v427_v28 }
 0x92d   :  { %1080 = vpow2.f32 %v917_v31 }
 0x935   :  { %v1079_v30 = vpop.eup %1078 }
 0x936   :  { %440 = vrot.lane.b32.xlu1 %v1079_v30, %s1168_s4 }
 0x937   :  { %v1081_v32 = vpop.eup %1080 }
 0x938   :  { %v431_v33 = vadd.f32 1.0, %v1081_v32 }
 0x93a   :  { %1082 = vrcp.f32 %v431_v33 }
 0x944   :  { %v1083_v35 = vpop.eup %1082 }
 0x945   :  { %v438_v39 = vmul.f32 %v1083_v35, %v436_v38 }
 0x9a8   :  { %v441_v36 = vpop.permute.xlu1 %440 }
 0x9a9   :  { %v443_v37 = vmul.f32 %v1083_v35, %v441_v36 }
 0x9ab   :  { %445 = vrot.lane.b32.xlu0 %v443_v37, %s1169_s25 }
 0xa1d   :  { %v446_v40 = vpop.permute.xlu0 %445 }
 0xa1e   :  { %v448_v41 = vadd.f32 %v446_v40, %v438_v39 }
 0xa20   :  { %1084 = vtanh.f32 %v448_v41  ;;  %v518_v60 = vrot.slane %v448_v41, 6 }
 0xa2a   :  { %v1085_v10 = vpop.eup %1084 }
 0xa2b   :  { %451 = vrot.lane.b32.xlu1 %v1085_v10, %s1168_s4 }
 0xa9d   :  { %v452_v42 = vpop.permute.xlu1 %451 }
 0xa9e   :  { %v1339_v43 = vmul.f32 %v1083_v35, %v452_v42 }
 0xaa0   :  { %v461_v44 = vpack.c.bf16 %v1339_v43, %v1339_v43 }
 0xaa2   :  { %v463_v45 = vrot.slane %v461_v44, 3 }
 0xaa4   :  { %464 = vrot.lane.b32.xlu0 %v463_v45, %s1169_s25 }
 0xb16   :  { %v465_v46 = vpop.permute.xlu0 %464 }
 0xb17   :  { %1005 = vmatmul.mubr.msk.bf16.vlgmr.msra.gmra.mrb[8].mxu1 %vm69_vm1, %v465_v46 }
 0xb18   :  { %1017 = vmatpush3.bf16.msra.mxu1 %v1236_v2  ;;  %1020 = vmatprep.mubr.msk.bf16.mxu1 %vm1167_vm0, %v1166_v1 }
 0xb19   :  { %1018 = vmatprep.subr.bf16.mxu1 %v1166_v1 }
 0xb1c   :  { %1019 = vmatpush3.bf16.msra.mxu1 %v1248_v4 }
 0xb1d   :  { %1032 = vmatprep.subr.bf16.mxu1 %v1166_v1 }
 0xbea   :  { %v503_v47 = vpop.f32.mrb[8].mxu1 }
 0xbeb   :  { %v509_v48 = vadd.f32 %v503_v47, %v1282_v16  ;;  %v1006_v49 = vpop.f32.mrb[9].mxu1 }
 0xbec   :  { %v506_v50 = vpop.f32.mrb[10].mxu1 }
 0xbed   :  { %1086 = vtanh.f32 %v509_v48  ;;  %v1007_v51 = vpop.f32.mrb[11].mxu1  ;;  %v919_v53 = vmul.f32 -1.442695, %v509_v48 }
 0xbef   :  { %1088 = vpow2.f32 %v919_v53 }
 0xbf7   :  { %v1087_v52 = vpop.eup %1086 }
 0xbf8   :  { %522 = vrot.lane.b32.xlu1 %v1087_v52, %s1168_s4 }
 0xbf9   :  { %v1089_v54 = vpop.eup %1088 }
 0xbfa   :  { %v513_v55 = vadd.f32 1.0, %v1089_v54 }
 0xbfc   :  { %1090 = vrcp.f32 %v513_v55 }
 0xc06   :  { %v1091_v57 = vpop.eup %1090 }
 0xc07   :  { %v520_v61 = vmul.f32 %v1091_v57, %v518_v60 }
 0xc6a   :  { %v523_v58 = vpop.permute.xlu1 %522 }
 0xc6b   :  { %v525_v59 = vmul.f32 %v1091_v57, %v523_v58 }
 0xc6d   :  { %527 = vrot.lane.b32.xlu0 %v525_v59, %s1169_s25 }
 0xcdf   :  { %v528_v62 = vpop.permute.xlu0 %527 }
 0xce0   :  { %v530_v63 = vadd.f32 %v528_v62, %v520_v61 }
 0xce2   :  { %1092 = vtanh.f32 %v530_v63 }
 0xcec   :  { %v1093_v0 = vpop.eup %1092 }
 0xced   :  { %533 = vrot.lane.b32.xlu1 %v1093_v0, %s1168_s4 }
 0xd5f   :  { %v534_v3 = vpop.permute.xlu1 %533 }
 0xd60   :  { %v1355_v5 = vmul.f32 %v1091_v57, %v534_v3 }
 0xd62   :  { %v542_v6 = vpack.c.bf16 %v1355_v5, %v1355_v5 }
 0xd64   :  { %544 = vrot.lane.b32.xlu0 %v542_v6, %s1169_s25 }
 0xdd6   :  { %v545_v7 = vpop.permute.xlu0 %544 }
 0xdd7   :  { %1013 = vmatmul.mubr.msk.bf16.vlgmr.msra.gmra.mrb[12].mxu0 %vm69_vm1, %v545_v7 }
 0xdd8   :  { %1025 = vmatpush3.bf16.msra.mxu0 %v1236_v2  ;;  %1028 = vmatprep.mubr.msk.bf16.mxu0 %vm1167_vm0, %v1166_v1 }
 0xdd9   :  { %1026 = vmatprep.subr.bf16.mxu0 %v1166_v1 }
 0xddc   :  { %1027 = vmatpush3.bf16.msra.mxu0 %v1248_v4  ;;  %v601_v4 = vrot.slane %v530_v63, 6 }
 0xeaa   :  { %v583_v8 = vpop.f32.mrb[12].mxu0 }
 0xeab   :  { %v590_v9 = vrot.slane %v583_v8, 6  ;;  %v1014_v11 = vpop.f32.mrb[13].mxu0 }
 0xeac   :  { %v586_v12 = vpop.f32.mrb[14].mxu0 }
 0xead   :  { %v592_v13 = vadd.f32 %v590_v9, %v1282_v16  ;;  %v1015_v14 = vpop.f32.mrb[15].mxu0 }
 0xeaf   :  { %1094 = vtanh.f32 %v592_v13  ;;  %v921_v17 = vmul.f32 -1.442695, %v592_v13 }
 0xeb1   :  { %1096 = vpow2.f32 %v921_v17 }
 0xeb9   :  { %v1095_v15 = vpop.eup %1094 }
 0xeba   :  { %605 = vrot.lane.b32.xlu1 %v1095_v15, %s1168_s4 }
 0xebb   :  { %v1097_v2 = vpop.eup %1096 }
 0xebc   :  { %v596_v18 = vadd.f32 1.0, %v1097_v2  ;;  %v1052_v2 = vld [vmem:[%s1453_s6] sm:$0xff]  }
 0xebe   :  { %1098 = vrcp.f32 %v596_v18  ;;  %v1053_v18 = vld [vmem:[%s1453_s6 + $0x8] sm:$0xff]   ;;  %s1171_s6 = smov [#allocation3]  }
 0xebf   :  { %s879_s30 = sshll.u32 %s1171_s6, 4  ;;  %s880_s30 = int_to_ptr.vmem [resolvable:$true] %s879_s30 }
 0xec0   :  { %s1118_s13 = scalar_lea.vmem %s880_s30, 32  ;;  %p1123_p1 = scmp.lt.s32.totalorder %s880_s30, %s880_s30 }
 0xec1   :  { %p1119_p0 = scmp.ne.s32.totalorder %s880_s30, %s1118_s13  ;;  %p1124_p2 = scmp.lt.s32.totalorder %s1118_s13, %s1118_s13 }
 0xec3   :  { %p1125_p3 = por %p1124_p2, %p1123_p1 }
 0xec5   :  { %p1126_p4 = pnand %p1125_p3, %p1119_p0 }
 0xec8   :  { %v1099_v19 = vpop.eup %1098 }
 0xec9   :  { %v603_v23 = vmul.f32 %v1099_v19, %v601_v4 }
 0xf2c   :  { %v606_v21 = vpop.permute.xlu1 %605 }
 0xf2d   :  { %v608_v22 = vmul.f32 %v1099_v19, %v606_v21 }
 0xf2f   :  { %610 = vrot.lane.b32.xlu0 %v608_v22, %s1169_s25 }
 0xfa1   :  { %v611_v24 = vpop.permute.xlu0 %610 }
 0xfa2   :  { %v613_v25 = vadd.f32 %v611_v24, %v603_v23 }
 0xfa4   :  { %1100 = vtanh.f32 %v613_v25  ;;  %v685_v46 = vrot.slane %v613_v25, 6 }
 0xfae   :  { %v1101_v26 = vpop.eup %1100 }
 0xfaf   :  { %616 = vrot.lane.b32.xlu1 %v1101_v26, %s1168_s4 }
0x1021   :  { %v617_v27 = vpop.permute.xlu1 %616 }
0x1022   :  { %v1370_v28 = vmul.f32 %v1099_v19, %v617_v27 }
0x1024   :  { %v625_v29 = vpack.c.bf16 %v1370_v28, %v1370_v28 }
0x1026   :  { %v627_v30 = vrot.slane %v625_v29, 1 }
0x1028   :  { %628 = vrot.lane.b32.xlu0 %v627_v30, %s1169_s25 }
0x109a   :  { %v629_v31 = vpop.permute.xlu0 %628 }
0x109b   :  { %1021 = vmatmul.mubr.msk.bf16.vlgmr.msra.gmra.mrb[12].mxu1 %vm69_vm1, %v629_v31 }
0x109c   :  { %1036 = vmatprep.mubr.msk.bf16.mxu1 %vm1167_vm0, %v1166_v1  ;;  %1033 = vmatpush3.bf16.msra.mxu1 %v1052_v2 }
0x109d   :  { %1034 = vmatprep.subr.bf16.mxu1 %v1166_v1 }
0x10a0   :  { %1035 = vmatpush3.bf16.msra.mxu1 %v1053_v18 }
0x116e   :  { %v667_v32 = vpop.f32.mrb[12].mxu1 }
0x116f   :  { %v674_v33 = vrot.slane %v667_v32, 4  ;;  %v1022_v35 = vpop.f32.mrb[13].mxu1 }
0x1170   :  { %v670_v36 = vpop.f32.mrb[14].mxu1 }
0x1171   :  { %v676_v37 = vadd.f32 %v674_v33, %v1282_v16  ;;  %v1023_v38 = vpop.f32.mrb[15].mxu1 }
0x1173   :  { %1102 = vtanh.f32 %v676_v37  ;;  %v923_v40 = vmul.f32 -1.442695, %v676_v37 }
0x1175   :  { %1104 = vpow2.f32 %v923_v40 }
0x117d   :  { %v1103_v39 = vpop.eup %1102 }
0x117e   :  { %689 = vrot.lane.b32.xlu1 %v1103_v39, %s1168_s4 }
0x117f   :  { %v1105_v41 = vpop.eup %1104 }
0x1180   :  { %v680_v10 = vadd.f32 1.0, %v1105_v41 }
0x1182   :  { %1106 = vrcp.f32 %v680_v10 }
0x118c   :  { %v1107_v42 = vpop.eup %1106 }
0x118d   :  { %v687_v47 = vmul.f32 %v1107_v42, %v685_v46 }
0x11f0   :  { %v690_v44 = vpop.permute.xlu1 %689 }
0x11f1   :  { %v692_v45 = vmul.f32 %v1107_v42, %v690_v44 }
0x11f3   :  { %694 = vrot.lane.b32.xlu0 %v692_v45, %s1169_s25 }
0x1265   :  { %v695_v48 = vpop.permute.xlu0 %694 }
0x1266   :  { %v697_v49 = vadd.f32 %v695_v48, %v687_v47 }
0x1268   :  { %1108 = vtanh.f32 %v697_v49 }
0x1272   :  { %v1109_v50 = vpop.eup %1108 }
0x1273   :  { %700 = vrot.lane.b32.xlu1 %v1109_v50, %s1168_s4 }
0x12e5   :  { %v701_v51 = vpop.permute.xlu1 %700 }
0x12e6   :  { %v703_v52 = vmul.f32 %v1107_v42, %v701_v51 }
0x12e8   :  { %v709_v53 = vpack.c.bf16 %v703_v52, %v703_v52 }
0x12ea   :  { %v711_v54 = vrot.slane %v709_v53, 2 }
0x12ec   :  { %712 = vrot.lane.b32.xlu0 %v711_v54, %s1169_s25 }
0x135e   :  { %v713_v55 = vpop.permute.xlu0 %712 }
0x135f   :  { %1029 = vmatmul.mubr.msk.bf16.vlgmr.msra.gmra.mrb[16].mxu0 %vm69_vm1, %v713_v55 }
0x1432   :  { %v751_v57 = vpop.f32.mrb[16].mxu0 }
0x1433   :  { %v758_v58 = vrot.slane %v751_v57, 2  ;;  %v1030_v59 = vpop.f32.mrb[17].mxu0 }
0x1434   :  { %v754_v60 = vpop.f32.mrb[18].mxu0 }
0x1435   :  { %v760_v61 = vadd.f32 %v758_v58, %v1282_v16  ;;  %v1031_v62 = vpop.f32.mrb[19].mxu0  ;;  %v769_v16 = vrot.slane %v697_v49, 6 }
0x1437   :  { %1110 = vtanh.f32 %v760_v61  ;;  %v925_v0 = vmul.f32 -1.442695, %v760_v61 }
0x1439   :  { %1112 = vpow2.f32 %v925_v0 }
0x1441   :  { %v1111_v63 = vpop.eup %1110 }
0x1442   :  { %773 = vrot.lane.b32.xlu1 %v1111_v63, %s1168_s4 }
0x1443   :  { %v1113_v3 = vpop.eup %1112 }
0x1444   :  { %v764_v6 = vadd.f32 1.0, %v1113_v3 }
0x1446   :  { %1114 = vrcp.f32 %v764_v6 }
0x1450   :  { %v1115_v7 = vpop.eup %1114 }
0x1451   :  { %v771_v11 = vmul.f32 %v1115_v7, %v769_v16 }
0x14b4   :  { %v774_v8 = vpop.permute.xlu1 %773 }
0x14b5   :  { %v776_v9 = vmul.f32 %v1115_v7, %v774_v8 }
0x14b7   :  { %778 = vrot.lane.b32.xlu0 %v776_v9, %s1169_s25 }
0x14bb   :  { %202 = vrot.lane.b32.xlu0 %v1291_v34, %s1169_s25 }
0x14bf   :  { %371 = vrot.lane.b32.xlu0 %v1323_v20, %s1169_s25 }
0x14c3   :  { %538 = vrot.lane.b32.xlu0 %v1355_v5, %s1169_s25 }
0x14c7   :  { %705 = vrot.lane.b32.xlu0 %v703_v52, %s1169_s25 }
0x1529   :  { %v779_v12 = vpop.permute.xlu0 %778 }
0x152a   :  { %v781_v13 = vadd.f32 %v779_v12, %v771_v11 }
0x152c   :  { %1116 = vtanh.f32 %v781_v13  ;;  %795 = vrot.lane.b32.xlu0 %v781_v13, %s1170_s2 }
0x152d   :  { %v203_v14 = vpop.permute.xlu0 %202 }
0x152e   :  { %206 = vst.msk [vmem:[#allocation2] sm:$0x3] %vm205_vm2, %v203_v14 }
0x1531   :  { %v372_v34 = vpop.permute.xlu0 %371 }
0x1532   :  { %375 = vst.msk [vmem:[#allocation2] sm:$0x30] %vm374_vm3, %v372_v34 }
0x1535   :  { %v539_v15 = vpop.permute.xlu0 %538 }
0x1536   :  { %v1117_v20 = vpop.eup %1116  ;;  %541 = vst.msk [vmem:[#allocation2 + $0x8] sm:$0x3] %vm205_vm2, %v539_v15 }
0x1537   :  { %784 = vrot.lane.b32.xlu1 %v1117_v20, %s1168_s4 }
0x1539   :  { %v706_v5 = vpop.permute.xlu0 %705 }
0x153a   :  { %708 = vst.msk [vmem:[#allocation2 + $0x8] sm:$0x30] %vm374_vm3, %v706_v5 }
0x153b   :  { %286 = vrot.lane.b32.xlu1 %v1307_v56, %s1169_s25 }
0x153f   :  { %456 = vrot.lane.b32.xlu1 %v1339_v43, %s1169_s25 }
0x1543   :  { %621 = vrot.lane.b32.xlu1 %v1370_v28, %s1169_s25 }
0x159e   :  { %v796_v17 = vpop.permute.xlu0 %795 }
0x159f   :  { %798 = vst.msk [vmem:[#allocation5 - $0x6] sm:$0xc0] %vm459_vm4, %v796_v17 }
0x15a9   :  { %v785_v56 = vpop.permute.xlu1 %784 }
0x15aa   :  { %v787_v43 = vmul.f32 %v1115_v7, %v785_v56 }
0x15ac   :  { %789 = vrot.lane.b32.xlu1 %v787_v43, %s1169_s25 }
0x15ad   :  { %v287_v19 = vpop.permute.xlu1 %286 }
0x15ae   :  { %290 = vst.msk [vmem:[#allocation2] sm:$0xc] %vm289_vm5, %v287_v19 }
0x15b1   :  { %v457_v21 = vpop.permute.xlu1 %456 }
0x15b2   :  { %460 = vst.msk [vmem:[#allocation2] sm:$0xc0] %vm459_vm4, %v457_v21 }
0x15b5   :  { %v622_v22 = vpop.permute.xlu1 %621 }
0x15b6   :  { %624 = vst.msk [vmem:[#allocation2 + $0x8] sm:$0xc] %vm289_vm5, %v622_v22 }
0x15b9   :  { %v799_v23 = vld [vmem:[#allocation2] sm:$0xff] }
0x161e   :  { %v790_v4 = vpop.permute.xlu1 %789 }
0x161f   :  { %792 = vst.msk [vmem:[#allocation2 + $0x8] sm:$0xc0] %vm459_vm4, %v790_v4  ;;  %793 = vst.msk [vmem:[#allocation3 - $0x6] sm:$0xc0] %vm459_vm4, %v790_v4 }
0x1626   :  { %v800_v1 = vld [vmem:[#allocation2 + $0x8] sm:$0xff] }
0x1627   :  { %v801_v24 = vpack.c.bf16 %v800_v1, %v799_v23 }
0x1629   :  { %1037 = vmatmul.mubr.msk.bf16.vlgmr.msra.gmra.mrb[16].mxu1 %vm69_vm1, %v801_v24 }
0x162a   :  { %1129 = shalt.err (!%p1126_p4)
}
0x162b   :  { %s1130_s16 = scalar_lea.hbm %s1456_s9, 32 }
0x162c   :  { %p1131_p5 = scmp.ne.s32.totalorder %s1456_s9, %s1130_s16  ;;  %p1134_p6 = scmp.lt.u32.totalorder %s1130_s16, %s1456_s9 }
0x162e   :  { %p1136_p7 = pnand %p1134_p6, %p1131_p5 }
0x1630   :  { %1139 = shalt.err (!%p1136_p7)
}
0x1631   :  { %882 = dma.vmem_to_hbm [thread:$0]  %s880_s30, 32, %s1456_s9, [#allocation4]  }
0x1632   :  { %s1140_s22 = scalar_lea.vmem %s890_s12, 32  ;;  %p1145_p9 = scmp.lt.s32.totalorder %s890_s12, %s890_s12 }
0x1633   :  { %p1141_p8 = scmp.ne.s32.totalorder %s890_s12, %s1140_s22  ;;  %p1146_p10 = scmp.lt.s32.totalorder %s1140_s22, %s1140_s22 }
0x1635   :  { %p1147_p11 = por %p1146_p10, %p1145_p9 }
0x1637   :  { %p1148_p12 = pnand %p1147_p11, %p1141_p8 }
0x1639   :  { %1151 = shalt.err (!%p1148_p12)
}
0x163a   :  { %s1152_s1 = scalar_lea.hbm %s1457_s10, 32 }
0x163b   :  { %p1153_p13 = scmp.ne.s32.totalorder %s1457_s10, %s1152_s1  ;;  %p1156_p0 = scmp.lt.u32.totalorder %s1152_s1, %s1457_s10 }
0x163d   :  { %p1158_p1 = pnand %p1156_p0, %p1153_p13 }
0x163f   :  { %1161 = shalt.err (!%p1158_p1)
}
0x1640   :  { %892 = dma.vmem_to_hbm [thread:$0]  %s890_s12, 32, %s1457_s10, [#allocation6]   ;;  %v926_v25 = vld [vmem:[%s1454_s7] ss:$0 sm:$0xff] }
0x16fc   :  { %v862_v26 = vpop.f32.mrb[16].mxu1 }
0x16fd   :  { %v863_v27 = vadd.f32 %v926_v25, %v862_v26  ;;  %v1038_v28 = vpop.f32.mrb[17].mxu1 }
0x16fe   :  { %v865_v29 = vpop.f32.mrb[18].mxu1 }
0x16ff   :  { %869 = vst [vmem:[%s1455_s8] sm:$0xff] %v863_v27  ;;  %v866_v30 = vadd.f32 %v926_v25, %v865_v29  ;;  %v1039_v31 = vpop.f32.mrb[19].mxu1 }
0x1701   :  { %870 = vst [vmem:[%s1455_s8 + $0x8] sm:$0xff] %v866_v30 }
0x1702   :  { %1162 = dma.done.wait [#allocation4], 32  }
0x1703   :  { %1163 = vsyncadd [#allocation4], 4294967264 }
0x1704   :  { %1164 = dma.done.wait [#allocation6], 32  }
0x1705   :  { %1165 = vsyncadd [#allocation6], 4294967264 }
0x1706   :  { %901 = vsyncpa [#allocation4], 1 }
0x1707   :  { %902 = vsyncpa [#allocation6], 1 }

</bundles_post_ra>
